<compile_context>
chip_gen: v7x
topology: tpu7x:2x2x1
jax: 0.10.0
libtpu: 0.0.40
codegen_flags: <defaults>
</compile_context>

<pallas_src>
import jax
import jax.numpy as jnp
from jax.experimental import pallas as pl
from jax.experimental.pallas import tpu as pltpu


def _round_up(x, m):
    return ((x + m - 1) // m) * m


def _affine_coupling_kernel(h1_ref, h2_ref,
                            w1_ref, b1_ref,
                            w2_ref, b2_ref,
                            w3s_ref, b3s_ref,
                            w3t_ref, b3t_ref,
                            out1_ref, logdet_ref):
    h1 = h1_ref[...]
    h2 = h2_ref[...]

    # MLP conditioner on h2: Linear -> ReLU -> Linear -> ReLU -> Linear(split)
    x = jnp.dot(h2, w1_ref[...], preferred_element_type=jnp.float32) + b1_ref[...]
    x = jnp.maximum(x, 0.0)
    x = jnp.dot(x, w2_ref[...], preferred_element_type=jnp.float32) + b2_ref[...]
    x = jnp.maximum(x, 0.0)
    logs_raw = jnp.dot(x, w3s_ref[...], preferred_element_type=jnp.float32) + b3s_ref[...]
    t = jnp.dot(x, w3t_ref[...], preferred_element_type=jnp.float32) + b3t_ref[...]

    logs = jax.nn.sigmoid(logs_raw + 2.0) + 1e-7
    s = jnp.exp(logs)

    # transformed half only; untouched h2 never round-trips through the kernel
    out1_ref[...] = s * h1 + t

    # per-row logdet partials: sum(log|s|) == sum(logs) since s = exp(logs) > 0
    logdet_ref[...] = jnp.sum(logs, axis=-1, keepdims=True)


def affine_coupling_forward(h, params, block_rows=512):
    """h: (B, dim) float32.  Returns (h_out (B, dim), logdet scalar)."""
    B, dim = h.shape
    d = dim // 2
    h1 = h[:, :d]
    h2 = h[:, d:]

    w1, b1, w2, b2, w3, b3 = params
    # PyTorch Linear stores W as (out, in); pre-transpose to (in, out) so the
    # kernel computes y = x @ W + b on the MXU.  Split the (d -> 2d) layer
    # column-wise into the logs- and t-producing halves.
    w1t = w1.T
    w2t = w2.T
    w3full = w3.T                       # (d, 2d)
    w3s = w3full[:, :d]
    w3t = w3full[:, d:]
    b1r = b1.reshape(1, d)
    b2r = b2.reshape(1, d)
    b3s = b3[:d].reshape(1, d)
    b3t = b3[d:].reshape(1, d)

    # batch tile: multiple of 8 (sublane), capped at block_rows
    TB = min(_round_up(B, 8), _round_up(block_rows, 8))
    B_pad = _round_up(B, TB)
    if B_pad != B:
        pad = ((0, B_pad - B), (0, 0))
        h1p = jnp.pad(h1, pad)
        h2p = jnp.pad(h2, pad)
    else:
        h1p, h2p = h1, h2
    num_tiles = B_pad // TB

    row_spec = pl.BlockSpec((TB, d), lambda i: (i, 0))        # batch-tiled
    w_spec = pl.BlockSpec((d, d), lambda i: (0, 0))           # VMEM-resident
    b_spec = pl.BlockSpec((1, d), lambda i: (0, 0))           # VMEM-resident

    # rough VMEM budget: resident params + double-buffered activation tiles
    param_bytes = 4 * (4 * d * d + 4 * d)
    act_bytes = 4 * (3 * TB * d + TB)
    vmem_limit = int(min(max(2 * param_bytes + 4 * act_bytes + (4 << 20), 16 << 20),
                         48 << 20))

    out1, logdet_rows = pl.pallas_call(
        _affine_coupling_kernel,
        grid=(num_tiles,),
        in_specs=[row_spec, row_spec,
                  w_spec, b_spec,
                  w_spec, b_spec,
                  w_spec, b_spec,
                  w_spec, b_spec],
        out_specs=(row_spec,
                   pl.BlockSpec((TB, 1), lambda i: (i, 0))),
        out_shape=(
            jax.ShapeDtypeStruct((B_pad, d), jnp.float32),
            jax.ShapeDtypeStruct((B_pad, 1), jnp.float32),
        ),
        compiler_params=pltpu.CompilerParams(
            dimension_semantics=("parallel",),
            vmem_limit_bytes=vmem_limit,
        ),
    )(h1p, h2p, w1t, b1r, w2t, b2r, w3s, b3s, w3t, b3t)

    h_out = jnp.concatenate([out1[:B], h2], axis=1)
    logdet = jnp.sum(logdet_rows[:B, 0])
    return h_out, logdet


def init_params(key, dim):
    """Deterministic parameter init matching NN(dim) shapes."""
    d = dim // 2
    ks = jax.random.split(key, 6)
    scale = 1.0 / jnp.sqrt(d)
    w1 = jax.random.uniform(ks[0], (d, d), jnp.float32, -scale, scale)
    b1 = jax.random.uniform(ks[1], (d,), jnp.float32, -scale, scale)
    w2 = jax.random.uniform(ks[2], (d, d), jnp.float32, -scale, scale)
    b2 = jax.random.uniform(ks[3], (d,), jnp.float32, -scale, scale)
    w3 = jax.random.uniform(ks[4], (2 * d, d), jnp.float32, -scale, scale)
    b3 = jax.random.uniform(ks[5], (2 * d,), jnp.float32, -scale, scale)
    return (w1, b1, w2, b2, w3, b3)


def reference_forward(h, params):
    """Pure-JAX reference mirroring the PyTorch forward."""
    w1, b1, w2, b2, w3, b3 = params
    B, dim = h.shape
    d = dim // 2
    h1, h2 = h[:, :d], h[:, d:]
    x = jnp.maximum(h2 @ w1.T + b1, 0.0)
    x = jnp.maximum(x @ w2.T + b2, 0.0)
    x = x @ w3.T + b3
    logs = jax.nn.sigmoid(x[:, :d] + 2.0) + 1e-7
    t = x[:, d:]
    s = jnp.exp(logs)
    h_out = jnp.concatenate([s * h1 + t, h2], axis=1)
    logdet = jnp.sum(jnp.log(jnp.abs(s)))
    return h_out, logdet


if __name__ == "__main__":
    key = jax.random.PRNGKey(0)
    k_h, k_p = jax.random.split(key)

    B, dim = 8, 32  # small test shapes: batch=8, feature dim=32 (half-dim 16)
    h = jax.random.normal(k_h, (B, dim), dtype=jnp.float32)
    params = init_params(k_p, dim)

    h_out, logdet = affine_coupling_forward(h, params)
    jax.block_until_ready((h_out, logdet))

    h_ref, logdet_ref = reference_forward(h, params)
    assert jnp.allclose(h_out, h_ref, atol=1e-5, rtol=1e-5)
    assert jnp.allclose(logdet, logdet_ref, atol=1e-5, rtol=1e-5)

    print("KERNEL_OK")
</pallas_src>

<mosaic_0001>
module attributes {stable_mosaic.version = 11 : i64} {
  func.func @_affine_coupling_kernel(%arg0: i32, %arg1: memref<8x16xf32, #tpu.memory_space<vmem>>, %arg2: memref<8x16xf32, #tpu.memory_space<vmem>>, %arg3: memref<16x16xf32, #tpu.memory_space<vmem>>, %arg4: memref<1x16xf32, #tpu.memory_space<vmem>>, %arg5: memref<16x16xf32, #tpu.memory_space<vmem>>, %arg6: memref<1x16xf32, #tpu.memory_space<vmem>>, %arg7: memref<16x16xf32, #tpu.memory_space<vmem>>, %arg8: memref<1x16xf32, #tpu.memory_space<vmem>>, %arg9: memref<16x16xf32, #tpu.memory_space<vmem>>, %arg10: memref<1x16xf32, #tpu.memory_space<vmem>>, %arg11: memref<8x16xf32, #tpu.memory_space<vmem>>, %arg12: memref<8x1xf32, #tpu.memory_space<vmem>>) attributes {dimension_semantics = [#tpu.dimension_semantics<parallel>], iteration_bounds = array<i64: 1>, scalar_prefetch = 0 : i64, scratch_operands = 0 : i64, tpu.core_type = #tpu.core_type<tc>, window_params = [{transform_indices = @transform_0, window_bounds = array<i64: 8, 16>}, {transform_indices = @transform_1, window_bounds = array<i64: 8, 16>}, {pipeline_mode = #tpu.pipeline_mode<synchronous>, transform_indices = @transform_2, window_bounds = array<i64: 16, 16>}, {pipeline_mode = #tpu.pipeline_mode<synchronous>, transform_indices = @transform_3, window_bounds = array<i64: 1, 16>}, {pipeline_mode = #tpu.pipeline_mode<synchronous>, transform_indices = @transform_4, window_bounds = array<i64: 16, 16>}, {pipeline_mode = #tpu.pipeline_mode<synchronous>, transform_indices = @transform_5, window_bounds = array<i64: 1, 16>}, {pipeline_mode = #tpu.pipeline_mode<synchronous>, transform_indices = @transform_6, window_bounds = array<i64: 16, 16>}, {pipeline_mode = #tpu.pipeline_mode<synchronous>, transform_indices = @transform_7, window_bounds = array<i64: 1, 16>}, {pipeline_mode = #tpu.pipeline_mode<synchronous>, transform_indices = @transform_8, window_bounds = array<i64: 16, 16>}, {pipeline_mode = #tpu.pipeline_mode<synchronous>, transform_indices = @transform_9, window_bounds = array<i64: 1, 16>}, {transform_indices = @transform_10, window_bounds = array<i64: 8, 16>}, {transform_indices = @transform_11, window_bounds = array<i64: 8, 1>}]} {
    %c0 = arith.constant 0 : index
    %c0_0 = arith.constant 0 : index
    %0 = vector.load %arg1[%c0, %c0_0] : memref<8x16xf32, #tpu.memory_space<vmem>>, vector<8x16xf32>
    %c0_1 = arith.constant 0 : index
    %c0_2 = arith.constant 0 : index
    %1 = vector.load %arg2[%c0_1, %c0_2] : memref<8x16xf32, #tpu.memory_space<vmem>>, vector<8x16xf32>
    %c0_3 = arith.constant 0 : index
    %c0_4 = arith.constant 0 : index
    %2 = vector.load %arg3[%c0_3, %c0_4] : memref<16x16xf32, #tpu.memory_space<vmem>>, vector<16x16xf32>
    %cst = arith.constant dense<0.000000e+00> : vector<8x16xf32>
    %3 = tpu.matmul %1, %2, %cst {dimension_numbers = #tpu.dot_dimension_numbers<[1], [0], [0], [1], [0, 0, 1, 1], [], []>} : vector<8x16xf32>, vector<16x16xf32>, vector<8x16xf32> -> vector<8x16xf32>
    %c0_5 = arith.constant 0 : index
    %c0_6 = arith.constant 0 : index
    %4 = vector.load %arg4[%c0_5, %c0_6] : memref<1x16xf32, #tpu.memory_space<vmem>>, vector<1x16xf32>
    %5 = vector.broadcast %4 : vector<1x16xf32> to vector<8x16xf32>
    %6 = arith.addf %3, %5 : vector<8x16xf32>
    %cst_7 = arith.constant 0.000000e+00 : f32
    %7 = vector.broadcast %cst_7 : f32 to vector<8x16xf32>
    %8 = arith.maximumf %6, %7 : vector<8x16xf32>
    %c0_8 = arith.constant 0 : index
    %c0_9 = arith.constant 0 : index
    %9 = vector.load %arg5[%c0_8, %c0_9] : memref<16x16xf32, #tpu.memory_space<vmem>>, vector<16x16xf32>
    %cst_10 = arith.constant dense<0.000000e+00> : vector<8x16xf32>
    %10 = tpu.matmul %8, %9, %cst_10 {dimension_numbers = #tpu.dot_dimension_numbers<[1], [0], [0], [1], [0, 0, 1, 1], [], []>} : vector<8x16xf32>, vector<16x16xf32>, vector<8x16xf32> -> vector<8x16xf32>
    %c0_11 = arith.constant 0 : index
    %c0_12 = arith.constant 0 : index
    %11 = vector.load %arg6[%c0_11, %c0_12] : memref<1x16xf32, #tpu.memory_space<vmem>>, vector<1x16xf32>
    %12 = vector.broadcast %11 : vector<1x16xf32> to vector<8x16xf32>
    %13 = arith.addf %10, %12 : vector<8x16xf32>
    %cst_13 = arith.constant 0.000000e+00 : f32
    %14 = vector.broadcast %cst_13 : f32 to vector<8x16xf32>
    %15 = arith.maximumf %13, %14 : vector<8x16xf32>
    %c0_14 = arith.constant 0 : index
    %c0_15 = arith.constant 0 : index
    %16 = vector.load %arg7[%c0_14, %c0_15] : memref<16x16xf32, #tpu.memory_space<vmem>>, vector<16x16xf32>
    %cst_16 = arith.constant dense<0.000000e+00> : vector<8x16xf32>
    %17 = tpu.matmul %15, %16, %cst_16 {dimension_numbers = #tpu.dot_dimension_numbers<[1], [0], [0], [1], [0, 0, 1, 1], [], []>} : vector<8x16xf32>, vector<16x16xf32>, vector<8x16xf32> -> vector<8x16xf32>
    %c0_17 = arith.constant 0 : index
    %c0_18 = arith.constant 0 : index
    %18 = vector.load %arg8[%c0_17, %c0_18] : memref<1x16xf32, #tpu.memory_space<vmem>>, vector<1x16xf32>
    %19 = vector.broadcast %18 : vector<1x16xf32> to vector<8x16xf32>
    %20 = arith.addf %17, %19 : vector<8x16xf32>
    %c0_19 = arith.constant 0 : index
    %c0_20 = arith.constant 0 : index
    %21 = vector.load %arg9[%c0_19, %c0_20] : memref<16x16xf32, #tpu.memory_space<vmem>>, vector<16x16xf32>
    %cst_21 = arith.constant dense<0.000000e+00> : vector<8x16xf32>
    %22 = tpu.matmul %15, %21, %cst_21 {dimension_numbers = #tpu.dot_dimension_numbers<[1], [0], [0], [1], [0, 0, 1, 1], [], []>} : vector<8x16xf32>, vector<16x16xf32>, vector<8x16xf32> -> vector<8x16xf32>
    %c0_22 = arith.constant 0 : index
    %c0_23 = arith.constant 0 : index
    %23 = vector.load %arg10[%c0_22, %c0_23] : memref<1x16xf32, #tpu.memory_space<vmem>>, vector<1x16xf32>
    %24 = vector.broadcast %23 : vector<1x16xf32> to vector<8x16xf32>
    %25 = arith.addf %22, %24 : vector<8x16xf32>
    %cst_24 = arith.constant 2.000000e+00 : f32
    %26 = vector.broadcast %cst_24 : f32 to vector<8x16xf32>
    %27 = arith.addf %20, %26 : vector<8x16xf32>
    %28 = arith.negf %27 : vector<8x16xf32>
    %29 = math.exp %28 : vector<8x16xf32>
    %cst_25 = arith.constant 1.000000e+00 : f32
    %30 = vector.broadcast %cst_25 : f32 to vector<8x16xf32>
    %31 = arith.addf %30, %29 : vector<8x16xf32>
    %32 = arith.divf %30, %31 : vector<8x16xf32>
    %cst_26 = arith.constant 1.000000e-07 : f32
    %33 = vector.broadcast %cst_26 : f32 to vector<8x16xf32>
    %34 = arith.addf %32, %33 : vector<8x16xf32>
    %35 = math.exp %34 : vector<8x16xf32>
    %36 = arith.mulf %35, %0 : vector<8x16xf32>
    %37 = arith.addf %36, %25 : vector<8x16xf32>
    %c0_27 = arith.constant 0 : index
    %c0_28 = arith.constant 0 : index
    %38 = vector.load %arg11[%c0_27, %c0_28] : memref<8x16xf32, #tpu.memory_space<vmem>>, vector<8x16xf32>
    tpu.vector_store %arg11[%c0_27, %c0_28], %37 {strides = array<i32>} : memref<8x16xf32, #tpu.memory_space<vmem>>, vector<8x16xf32>,
    %cst_29 = arith.constant dense<0.000000e+00> : vector<8xf32>
    %39 = vector.multi_reduction <add>, %34, %cst_29 [1] : vector<8x16xf32> to vector<8xf32>
    %40 = vector.shape_cast %39 : vector<8xf32> to vector<8x1xf32>
    %c0_30 = arith.constant 0 : index
    %c0_31 = arith.constant 0 : index
    %41 = vector.load %arg12[%c0_30, %c0_31] : memref<8x1xf32, #tpu.memory_space<vmem>>, vector<8x1xf32>
    tpu.vector_store %arg12[%c0_30, %c0_31], %40 {strides = array<i32>} : memref<8x1xf32, #tpu.memory_space<vmem>>, vector<8x1xf32>,
    return
  }
  func.func @transform_0(%arg0: i32) -> (i32, i32) {
    %c0_i32 = arith.constant 0 : i32
    %c0_i32_0 = arith.constant 0 : i32
    return %arg0, %c0_i32 : i32, i32
  }
  func.func @transform_1(%arg0: i32) -> (i32, i32) {
    %c0_i32 = arith.constant 0 : i32
    %c0_i32_0 = arith.constant 0 : i32
    return %arg0, %c0_i32 : i32, i32
  }
  func.func @transform_2(%arg0: i32) -> (i32, i32) {
    %c0_i32 = arith.constant 0 : i32
    %c0_i32_0 = arith.constant 0 : i32
    %c0_i32_1 = arith.constant 0 : i32
    return %c0_i32, %c0_i32_0 : i32, i32
  }
  func.func @transform_3(%arg0: i32) -> (i32, i32) {
    %c0_i32 = arith.constant 0 : i32
    %c0_i32_0 = arith.constant 0 : i32
    %c0_i32_1 = arith.constant 0 : i32
    return %c0_i32, %c0_i32_0 : i32, i32
  }
  func.func @transform_4(%arg0: i32) -> (i32, i32) {
    %c0_i32 = arith.constant 0 : i32
    %c0_i32_0 = arith.constant 0 : i32
    %c0_i32_1 = arith.constant 0 : i32
    return %c0_i32, %c0_i32_0 : i32, i32
  }
  func.func @transform_5(%arg0: i32) -> (i32, i32) {
    %c0_i32 = arith.constant 0 : i32
    %c0_i32_0 = arith.constant 0 : i32
    %c0_i32_1 = arith.constant 0 : i32
    return %c0_i32, %c0_i32_0 : i32, i32
  }
  func.func @transform_6(%arg0: i32) -> (i32, i32) {
    %c0_i32 = arith.constant 0 : i32
    %c0_i32_0 = arith.constant 0 : i32
    %c0_i32_1 = arith.constant 0 : i32
    return %c0_i32, %c0_i32_0 : i32, i32
  }
  func.func @transform_7(%arg0: i32) -> (i32, i32) {
    %c0_i32 = arith.constant 0 : i32
    %c0_i32_0 = arith.constant 0 : i32
    %c0_i32_1 = arith.constant 0 : i32
    return %c0_i32, %c0_i32_0 : i32, i32
  }
  func.func @transform_8(%arg0: i32) -> (i32, i32) {
    %c0_i32 = arith.constant 0 : i32
    %c0_i32_0 = arith.constant 0 : i32
    %c0_i32_1 = arith.constant 0 : i32
    return %c0_i32, %c0_i32_0 : i32, i32
  }
  func.func @transform_9(%arg0: i32) -> (i32, i32) {
    %c0_i32 = arith.constant 0 : i32
    %c0_i32_0 = arith.constant 0 : i32
    %c0_i32_1 = arith.constant 0 : i32
    return %c0_i32, %c0_i32_0 : i32, i32
  }
  func.func @transform_10(%arg0: i32) -> (i32, i32) {
    %c0_i32 = arith.constant 0 : i32
    %c0_i32_0 = arith.constant 0 : i32
    return %arg0, %c0_i32 : i32, i32
  }
  func.func @transform_11(%arg0: i32) -> (i32, i32) {
    %c0_i32 = arith.constant 0 : i32
    %c0_i32_0 = arith.constant 0 : i32
    return %arg0, %c0_i32 : i32, i32
  }
}

</mosaic_0001>

<bundles_post_ra>
// kernel: tpu_custom_call.1
= control target key start
LH: loop header
LB: loop body
LE: loop exit
PB: predicated region body
PF: predicated region fallthrough
CT: control target
= control target key end

     0   :  { %17 = vsyncpa [#allocation3], 0  ;;  %s872_s0 = inlined_call_operand.hbm [shape: f32[8,16], index: 0, kind: input, shape index: {}]   ;;  %s873_s1 = inlined_call_operand.hbm [shape: f32[8,16], index: 1, kind: input, shape index: {}]   ;;  %s874_s2 = inlined_call_operand.hbm [shape: f32[16,16], index: 2, kind: input, shape index: {}]   ;;  %s875_s3 = inlined_call_operand.vmem [shape: f32[1,16], index: 3, kind: input, shape index: {}]   ;;  %s876_s4 = inlined_call_operand.hbm [shape: f32[16,16], index: 4, kind: input, shape index: {}]   ;;  %s877_s5 = inlined_call_operand.vmem [shape: f32[1,16], index: 5, kind: input, shape index: {}]   ;;  %s878_s6 = inlined_call_operand.vmem [shape: f32[16,16], index: 6, kind: input, shape index: {}]   ;;  %s879_s7 = inlined_call_operand.vmem [shape: f32[1,16], index: 7, kind: input, shape index: {}]   ;;  %s880_s8 = inlined_call_operand.hbm [shape: f32[16,16], index: 8, kind: input, shape index: {}]   ;;  %s881_s9 = inlined_call_operand.vmem [shape: f32[1,16], index: 9, kind: input, shape index: {}]   ;;  %s882_s10 = inlined_call_operand.hbm [shape: f32[8,16], index: 10, kind: output, shape index: {0}]   ;;  %s883_s11 = inlined_call_operand.vmem [shape: f32[8,1], index: 11, kind: output, shape index: {1}]  }
   0x1   :  { %18 = vsyncpa [#allocation6], 0 }
   0x2   :  { %19 = vsyncpa [#allocation9], 0 }
   0x3   :  { %20 = vsyncpa [#allocation4], 0  ;;  %s689_s17 = smov [#allocation5]   ;;  %s549_s21 = scalar_lea.hbm %s873_s1, 128 }
   0x4   :  { %s37_s18 = sshll.u32 %s689_s17, 4  ;;  %p550_p0 = scmp.ne.s32.totalorder %s873_s1, %s549_s21  ;;  %s38_s18 = int_to_ptr.vmem [resolvable:$true] %s37_s18 }
   0x5   :  { %p553_p1 = scmp.lt.u32.totalorder %s549_s21, %s873_s1 }
   0x7   :  { %p555_p2 = pnand %p553_p1, %p550_p0 }
   0x9   :  { %558 = shalt.err (!%p555_p2)
}
   0xa   :  { %s559_s26 = scalar_lea.vmem %s38_s18, 128  ;;  %p564_p4 = scmp.lt.s32.totalorder %s38_s18, %s38_s18 }
   0xb   :  { %p560_p3 = scmp.ne.s32.totalorder %s38_s18, %s559_s26  ;;  %p565_p5 = scmp.lt.s32.totalorder %s559_s26, %s559_s26 }
   0xd   :  { %p566_p6 = por %p565_p5, %p564_p4 }
   0xf   :  { %p567_p7 = pnand %p566_p6, %p560_p3 }
  0x11   :  { %570 = shalt.err (!%p567_p7)
}
  0x12   :  { %40 = dma.hbm_to_vmem [thread:$0]  %s873_s1, 128, %s38_s18, [#allocation6]  }
  0x13   :  { %s690_s29 = smov [#allocation8]   ;;  %s691_s12 = smov [#allocation2]  }
  0x14   :  { %s60_s30 = sshll.u32 %s690_s29, 4  ;;  %s27_s13 = sshll.u32 %s691_s12, 4  ;;  %s61_s30 = int_to_ptr.vmem [resolvable:$true] %s60_s30  ;;  %s28_s13 = int_to_ptr.vmem [resolvable:$true] %s27_s13 }
  0x15   :  { %s571_s16 = scalar_lea.hbm %s876_s4, 256 }
  0x16   :  { %p572_p8 = scmp.ne.s32.totalorder %s876_s4, %s571_s16  ;;  %p575_p9 = scmp.lt.u32.totalorder %s571_s16, %s876_s4 }
  0x18   :  { %p577_p10 = pnand %p575_p9, %p572_p8 }
  0x1a   :  { %580 = shalt.err (!%p577_p10)
}
  0x1b   :  { %s581_s1 = scalar_lea.vmem %s61_s30, 256  ;;  %p586_p12 = scmp.lt.s32.totalorder %s61_s30, %s61_s30 }
  0x1c   :  { %p582_p11 = scmp.ne.s32.totalorder %s61_s30, %s581_s1  ;;  %p587_p13 = scmp.lt.s32.totalorder %s581_s1, %s581_s1 }
  0x1e   :  { %p588_p0 = por %p587_p13, %p586_p12 }
  0x20   :  { %p589_p1 = pnand %p588_p0, %p582_p11 }
  0x22   :  { %592 = shalt.err (!%p589_p1)
}
  0x23   :  { %s692_s18 = smov 128   ;;  %s693_s22 = smov 8  }
  0x24   :  { %66 = dma.hbm_to_vmem [thread:$0]  %s876_s4, 256, %s61_s30, [#allocation9], %s692_s18, %s692_s18, %s693_s22  }
  0x25   :  { %s593_s27 = scalar_lea.hbm %s872_s0, 128 }
  0x26   :  { %p594_p2 = scmp.ne.s32.totalorder %s872_s0, %s593_s27  ;;  %p597_p3 = scmp.lt.u32.totalorder %s593_s27, %s872_s0 }
  0x28   :  { %p599_p4 = pnand %p597_p3, %p594_p2 }
  0x2a   :  { %602 = shalt.err (!%p599_p4)
}
  0x2b   :  { %s603_s15 = scalar_lea.vmem %s28_s13, 128  ;;  %p608_p6 = scmp.lt.s32.totalorder %s28_s13, %s28_s13 }
  0x2c   :  { %p604_p5 = scmp.ne.s32.totalorder %s28_s13, %s603_s15  ;;  %p609_p7 = scmp.lt.s32.totalorder %s603_s15, %s603_s15 }
  0x2e   :  { %p610_p8 = por %p609_p7, %p608_p6 }
  0x30   :  { %p611_p9 = pnand %p610_p8, %p604_p5 }
  0x32   :  { %614 = shalt.err (!%p611_p9)
}
  0x33   :  { %30 = dma.hbm_to_vmem [thread:$0]  %s872_s0, 128, %s28_s13, [#allocation3]  }
  0x34   :  { %s694_s16 = smov [#allocation7]   ;;  %s695_s19 = smov [#allocation10]  }
  0x35   :  { %s46_s17 = sshll.u32 %s694_s16, 4  ;;  %s78_s20 = sshll.u32 %s695_s19, 4  ;;  %s47_s17 = int_to_ptr.vmem [resolvable:$true] %s46_s17  ;;  %s79_s20 = int_to_ptr.vmem [resolvable:$true] %s78_s20 }
  0x36   :  { %s615_s23 = scalar_lea.hbm %s874_s2, 256 }
  0x37   :  { %p616_p10 = scmp.ne.s32.totalorder %s874_s2, %s615_s23  ;;  %p619_p11 = scmp.lt.u32.totalorder %s615_s23, %s874_s2 }
  0x39   :  { %p621_p12 = pnand %p619_p11, %p616_p10 }
  0x3b   :  { %624 = shalt.err (!%p621_p12)
}
  0x3c   :  { %s625_s0 = scalar_lea.vmem %s47_s17, 256  ;;  %p630_p0 = scmp.lt.s32.totalorder %s47_s17, %s47_s17 }
  0x3d   :  { %p626_p13 = scmp.ne.s32.totalorder %s47_s17, %s625_s0  ;;  %p631_p1 = scmp.lt.s32.totalorder %s625_s0, %s625_s0 }
  0x3f   :  { %p632_p2 = por %p631_p1, %p630_p0 }
  0x41   :  { %p633_p3 = pnand %p632_p2, %p626_p13 }
  0x43   :  { %636 = shalt.err (!%p633_p3)
}
  0x44   :  { %52 = dma.hbm_to_vmem [thread:$0]  %s874_s2, 256, %s47_s17, [#allocation6], %s692_s18, %s692_s18, %s693_s22  }
  0x45   :  { %s637_s14 = scalar_lea.hbm %s880_s8, 256 }
  0x46   :  { %p638_p4 = scmp.ne.s32.totalorder %s880_s8, %s637_s14  ;;  %p641_p5 = scmp.lt.u32.totalorder %s637_s14, %s880_s8 }
  0x48   :  { %p643_p6 = pnand %p641_p5, %p638_p4 }
  0x4a   :  { %646 = shalt.err (!%p643_p6)
}
  0x4b   :  { %s647_s19 = scalar_lea.vmem %s79_s20, 256  ;;  %p652_p8 = scmp.lt.s32.totalorder %s79_s20, %s79_s20 }
  0x4c   :  { %p648_p7 = scmp.ne.s32.totalorder %s79_s20, %s647_s19  ;;  %p653_p9 = scmp.lt.s32.totalorder %s647_s19, %s647_s19 }
  0x4e   :  { %p654_p10 = por %p653_p9, %p652_p8 }
  0x50   :  { %p655_p11 = pnand %p654_p10, %p648_p7 }
  0x52   :  { %658 = shalt.err (!%p655_p11)
}
  0x53   :  { %84 = dma.hbm_to_vmem [thread:$0]  %s880_s8, 256, %s79_s20, [#allocation9], %s692_s18, %s692_s18, %s693_s22  }
  0x54   :  { %681 = dma.done.wait [#allocation3], 128  }
  0x55   :  { %682 = vsyncadd [#allocation3], 4294967168 }
  0x56   :  { %683 = dma.done.wait [#allocation6], 384  }
  0x57   :  { %684 = vsyncadd [#allocation6], 4294966912 }
  0x58   :  { %685 = dma.done.wait [#allocation9], 512  }
  0x59   :  { %686 = vsyncadd [#allocation9], 4294966784  ;;  %v696_v0 = vmov 0.0|0.0   ;;  %vm697_vm0 = vmmov 0   ;;  %v698_v1 = vmov 0.0   ;;  %v104_v2 = vld [vmem:[#allocation7] sm:$0xff] }
  0x5a   :  { %520 = vmatprep.subr.bf16.mxu0 %v696_v0  ;;  %496 = vmatprep.mubr.msk.f32.mxu0 %vm697_vm0, %v698_v1  ;;  %v105_v3 = vld [vmem:[#allocation7 + $0x8] sm:$0xff]  ;;  %v103_v5 = vld [vmem:[#allocation5] sm:$0xff]  ;;  %vm113_vm1 = vcmask 130048   ;;  %v188_v6 = vld [vmem:[#allocation8] sm:$0xff]  ;;  %s699_s25 = smov [#allocation11]  }
  0x5b   :  { %523 = vmatprep.subr.bf16.mxu1 %v696_v0  ;;  %503 = vmatprep.mubr.msk.f32.mxu1 %vm697_vm0, %v698_v1  ;;  %v521_v4 = vpack.c.bf16 %v105_v3, %v104_v2  ;;  %v189_v7 = vld [vmem:[#allocation8 + $0x8] sm:$0xff]  ;;  %v272_v15 = vld [vmem:[%s878_s6 + $0x8] sm:$0xff]  ;;  %v354_v18 = vld [vmem:[#allocation10 + $0x8] sm:$0xff]  ;;  %s456_s26 = sshll.u32 %s699_s25, 4  ;;  %s457_s26 = int_to_ptr.vmem [resolvable:$true] %s456_s26 }
  0x5c   :  { %v524_v8 = vpack.c.bf16 %v189_v7, %v188_v6  ;;  %v471_v9 = vld [vmem:[%s875_s3] ss:$0 sm:$0xff]  ;;  %v353_v16 = vld [vmem:[#allocation10] sm:$0xff]  ;;  %v102_v40 = vld [vmem:[#allocation2] sm:$0xff]  ;;  %s659_s27 = scalar_lea.vmem %s457_s26, 128  ;;  %p664_p13 = scmp.lt.s32.totalorder %s457_s26, %s457_s26 }
  0x5d   :  { %522 = vmatpush3.bf16.msra.mxu0 %v521_v4  ;;  %v271_v14 = vld [vmem:[%s878_s6] sm:$0xff]  ;;  %v530_v19 = vpack.c.bf16 %v354_v18, %v353_v16  ;;  %p660_p12 = scmp.ne.s32.totalorder %s457_s26, %s659_s27  ;;  %p665_p0 = scmp.lt.s32.totalorder %s659_s27, %s659_s27 }
  0x5e   :  { %526 = vmatprep.subr.bf16.mxu0 %v696_v0  ;;  %525 = vmatpush3.bf16.msra.mxu1 %v524_v8  ;;  %v527_v17 = vpack.c.bf16 %v272_v15, %v271_v14  ;;  %v473_v20 = vld [vmem:[%s877_s5] ss:$0 sm:$0xff] }
  0x5f   :  { %529 = vmatprep.subr.bf16.mxu1 %v696_v0  ;;  %v475_v25 = vld [vmem:[%s879_s7] ss:$0 sm:$0xff]  ;;  %p666_p1 = por %p665_p0, %p664_p13 }
  0x60   :  { %497 = vmatmul.mubr.msk.f32.vlgmr.msra.gmra.mrb[0].mxu0 %vm113_vm1, %v103_v5  ;;  %v477_v39 = vld [vmem:[%s881_s9] ss:$0 sm:$0xff] }
  0x61   :  { %510 = vmatprep.mubr.msk.f32.mxu0 %vm697_vm0, %v698_v1  ;;  %528 = vmatpush3.bf16.msra.mxu0 %v527_v17  ;;  %p667_p2 = pnand %p666_p1, %p660_p12 }
 0x133   :  { %v183_v10 = vpop.f32.mrb[0].mxu0 }
 0x134   :  { %v184_v11 = vadd.f32 %v471_v9, %v183_v10  ;;  %v498_v12 = vpop.f32.mrb[1].mxu0 }
 0x136   :  { %v187_v13 = vmax.f32 %v184_v11, 0.0 }
 0x138   :  { %504 = vmatmul.mubr.msk.f32.vlgmr.msra.gmra.mrb[0].mxu1 %vm113_vm1, %v187_v13 }
 0x139   :  { %517 = vmatprep.mubr.msk.f32.mxu1 %vm697_vm0, %v698_v1  ;;  %531 = vmatpush3.bf16.msra.mxu1 %v530_v19 }
 0x20b   :  { %v266_v21 = vpop.f32.mrb[0].mxu1 }
 0x20c   :  { %v267_v22 = vadd.f32 %v473_v20, %v266_v21  ;;  %v505_v23 = vpop.f32.mrb[1].mxu1 }
 0x20e   :  { %v270_v24 = vmax.f32 %v267_v22, 0.0 }
 0x210   :  { %511 = vmatmul.mubr.msk.f32.vlgmr.msra.gmra.mrb[2].mxu0 %vm113_vm1, %v270_v24  ;;  %518 = vmatmul.mubr.msk.f32.vlgmr.msra.gmra.mrb[2].mxu1 %vm113_vm1, %v270_v24 }
 0x2e3   :  { %v349_v26 = vpop.f32.mrb[2].mxu0  ;;  %v428_v27 = vpop.f32.mrb[2].mxu1 }
 0x2e4   :  { %v350_v28 = vadd.f32 %v475_v25, %v349_v26  ;;  %v512_v29 = vpop.f32.mrb[3].mxu0  ;;  %v519_v30 = vpop.f32.mrb[3].mxu1  ;;  %v429_v42 = vadd.f32 %v477_v39, %v428_v27 }
 0x2e6   :  { %v432_v31 = vadd.f32 2.0, %v350_v28 }
 0x2e8   :  { %v479_v32 = vmul.f32 -1.442695, %v432_v31 }
 0x2ea   :  { %543 = vpow2.f32 %v479_v32 }
 0x2f4   :  { %v544_v33 = vpop.eup %543 }
 0x2f5   :  { %v436_v34 = vadd.f32 1.0, %v544_v33 }
 0x2f7   :  { %545 = vrcp.f32 %v436_v34 }
 0x301   :  { %v546_v35 = vpop.eup %545 }
 0x302   :  { %v439_v36 = vadd.f32 1e-07, %v546_v35 }
 0x304   :  { %v440_v37 = vmul.f32 1.442695, %v439_v36  ;;  %v445_v38 = vsel %vm113_vm1, %v439_v36, 0.0 }
 0x305   :  { %446 = vadd.xlane.f32.xlu0 %v445_v38 }
 0x306   :  { %547 = vpow2.f32 %v440_v37 }
 0x310   :  { %v548_v41 = vpop.eup %547 }
 0x311   :  { %v442_v43 = vmul.f32 %v548_v41, %v102_v40 }
 0x313   :  { %v443_v44 = vadd.f32 %v442_v43, %v429_v42 }
 0x315   :  { %444 = vst.msk [vmem:[#allocation11] sm:$0xff] %vm113_vm1, %v443_v44 }
 0x316   :  { %670 = shalt.err (!%p667_p2)
}
 0x317   :  { %s671_s9 = scalar_lea.hbm %s882_s10, 128 }
 0x318   :  { %p672_p3 = scmp.ne.s32.totalorder %s882_s10, %s671_s9  ;;  %p675_p4 = scmp.lt.u32.totalorder %s671_s9, %s882_s10 }
 0x31a   :  { %p677_p5 = pnand %p675_p4, %p672_p3 }
 0x31c   :  { %680 = shalt.err (!%p677_p5)
}
 0x31d   :  { %459 = dma.vmem_to_hbm [thread:$0]  %s457_s26, 128, %s882_s10, [#allocation4]   ;;  %vm448_vm2 = vcmask 7168  }
 0x392   :  { %v447_v45 = vpop.xlane.xlu0 %446 }
 0x393   :  { %449 = vst.msk [vmem:[%s883_s11] sm:$0xff] %vm448_vm2, %v447_v45 }
 0x394   :  { %687 = dma.done.wait [#allocation4], 128  }
 0x395   :  { %688 = vsyncadd [#allocation4], 4294967168 }
 0x396   :  { %467 = vsyncpa [#allocation3], 1 }
 0x397   :  { %468 = vsyncpa [#allocation6], 1 }
 0x398   :  { %469 = vsyncpa [#allocation9], 1 }
 0x399   :  { %470 = vsyncpa [#allocation4], 1 }

</bundles_post_ra>
